<compile_context>
chip_gen: v7x
topology: tpu7x:2x2x1
jax: 0.10.0
libtpu: 0.0.40
codegen_flags: <defaults>
</compile_context>

<pallas_src>
import jax
import jax.numpy as jnp
from jax.experimental import pallas as pl
from jax.experimental.pallas import tpu as pltpu


def critic_kernel(x_ref, w1_ref, b1_ref, w2_ref, b2_ref, w3_ref, b3_ref, o_ref):
    x = x_ref[...]                                                    # (1, tb)  lane-dense

    # fc_1 + ReLU: K=1 "matmul" is just an outer-product broadcast -> VPU only.
    h1 = jnp.maximum(w1_ref[...] * x + b1_ref[...], 0.0)             # (H, tb)

    # fc_2 + ReLU: the only real matmul -> MXU, f32 accumulate.
    # NOTE: default TPU matmul precision; pass precision=lax.Precision.HIGHEST if exact-f32
    # parity with torch is required at large H.
    h2 = jnp.dot(w2_ref[...], h1, preferred_element_type=jnp.float32)
    h2 = jnp.maximum(h2 + b2_ref[...], 0.0)                          # (H, tb)

    # fc_3 + sigmoid: N=1 matmul -> VPU multiply + sublane reduce (XLU), no MXU.
    z = jnp.sum(w3_ref[...] * h2, axis=0, keepdims=True) + b3_ref[0]  # (1, tb)
    o_ref[...] = jax.nn.sigmoid(z).astype(o_ref.dtype)                # exp on EUP


# Batch-tile cap. At H=32 the per-step working set is ~2*H*tb*4 ≈ 2 MiB of (H, tb)
# intermediates plus 8*tb bytes of x/out tiles — comfortably inside VMEM on v5e/v6e/v7x.
_MAX_TB = 8192


def _plan_batch(B):
    """Return (tb, padded_B).

    B <= _MAX_TB: one grid step with block == full array (no alignment constraint, no padding).
    B  > _MAX_TB: largest 512-multiple tile <= _MAX_TB that divides B with an even grid
                  (both v7x TCs busy, zero padding); else any 512-multiple divisor; else
                  tb=_MAX_TB with the batch padded up to an even grid.
    """
    if B <= _MAX_TB:
        return B, B
    for tb in range(_MAX_TB, 0, -512):
        if B % tb == 0 and (B // tb) % 2 == 0:
            return tb, B
    for tb in range(_MAX_TB, 0, -512):
        if B % tb == 0:
            return tb, B
    tb = _MAX_TB
    grid = -(-B // tb)
    grid += grid % 2
    return tb, tb * grid


def critic_with_sigmoid(x, params, *, tb=None):
    """x: (B, 1) float32.
    params: w1 (H,1), b1 (H,1), w2 (H,H), b2 (H,1), w3 (H,1), b3 (1,)  -- torch (out,in) layout.
    Returns (B, 1) float32."""
    B, one = x.shape
    assert one == 1
    H = params["w2"].shape[0]

    # (B,1) and (1,B) are layout-identical: reshape is metadata-only (no transpose copy).
    x_row = x.reshape(1, B)

    if tb is None:
        tb, Bp = _plan_batch(B)
    else:
        Bp = -(-B // tb) * tb
        assert tb == Bp or tb % 128 == 0, "partial batch tiles must be lane-aligned (x128)"

    if Bp != B:
        x_row = jnp.pad(x_row, ((0, 0), (0, Bp - B)))  # padded lanes compute garbage, sliced off

    # Weights resident across grid steps (constant index_map).
    full = lambda shape: pl.BlockSpec(shape, lambda i: (0, 0))

    # TODO(synk): before scaling H far beyond 32: single-buffer the weight blocks
    # (pipeline_mode=pl.Buffered(1)), tile the K dim of w2 with an inner 'arbitrary' grid axis +
    # f32 VMEM accumulator (a double-buffered f32 w2 alone saturates v7x's 32 MiB scoped VMEM at
    # H~2048), and cast w2/h1 to bf16 for the MXU pass on v6e/v7x (keep the f32 accumulate).

    out_row = pl.pallas_call(
        critic_kernel,
        out_shape=jax.ShapeDtypeStruct((1, Bp), jnp.float32),
        grid_spec=pltpu.PrefetchScalarGridSpec(
            num_scalar_prefetch=0,
            grid=(Bp // tb,),
            in_specs=[
                pl.BlockSpec((1, tb), lambda i: (0, i)),         # x   (lane-dense batch tile)
                full((H, 1)),                                    # w1
                full((H, 1)),                                    # b1
                full((H, H)),                                    # w2
                full((H, 1)),                                    # b2
                full((H, 1)),                                    # w3
                pl.BlockSpec(memory_space=pltpu.SMEM),           # b3  (1-D scalar in SMEM)
            ],
            out_specs=pl.BlockSpec((1, tb), lambda i: (0, i)),   # lane-dense output
        ),
        compiler_params=pltpu.CompilerParams(dimension_semantics=("parallel",)),
    )(x_row, params["w1"], params["b1"], params["w2"], params["b2"],
      params["w3"], params["b3"])

    return out_row[:, :B].reshape(B, 1)


def init_params(key, num_hidden):
    """Deterministic init mimicking PyTorch Linear default: U(-1/sqrt(fan_in), 1/sqrt(fan_in)).
    Weights stored (out, in); biases as column vectors (b3 as a 1-D scalar)."""
    def linear(key, fan_in, fan_out):
        kw, kb = jax.random.split(key)
        bound = 1.0 / jnp.sqrt(fan_in)
        w = jax.random.uniform(kw, (fan_out, fan_in), jnp.float32, -bound, bound)
        b = jax.random.uniform(kb, (fan_out, 1), jnp.float32, -bound, bound)
        return w, b

    k1, k2, k3 = jax.random.split(key, 3)
    w1, b1 = linear(k1, 1, num_hidden)            # (H,1), (H,1)
    w2, b2 = linear(k2, num_hidden, num_hidden)   # (H,H), (H,1)
    w3_row, b3 = linear(k3, num_hidden, 1)        # (1,H), (1,1)
    return {"w1": w1, "b1": b1, "w2": w2, "b2": b2,
            "w3": w3_row.T, "b3": b3.reshape(-1)}


def critic_ref(x, p):
    """Pure-JAX reference with the same parameters (batch-major math, like torch)."""
    h1 = jnp.maximum(x @ p["w1"].T + p["b1"].T, 0.0)
    h2 = jnp.maximum(h1 @ p["w2"].T + p["b2"].T, 0.0)
    return jax.nn.sigmoid(h2 @ p["w3"] + p["b3"])


if __name__ == "__main__":
    key = jax.random.PRNGKey(0)
    k_param, k_x = jax.random.split(key)

    num_hidden = 32
    params = init_params(k_param, num_hidden)

    # (batch, tb): single-step, arbitrary non-128 batch, and tiled+padded path.
    for batch, tile in ((128, None), (1000, None), (300, 128)):
        kx = jax.random.fold_in(k_x, batch)
        x = jax.random.normal(kx, (batch, 1), jnp.float32)

        out = jax.block_until_ready(critic_with_sigmoid(x, params, tb=tile))
        ref = critic_ref(x, params)

        assert out.shape == (batch, 1)
        assert jnp.allclose(out, ref, atol=1e-5, rtol=1e-5), f"mismatch vs reference at batch={batch}"

    print("KERNEL_OK")
</pallas_src>

<mosaic_0001>
module attributes {stable_mosaic.version = 11 : i64} {
  func.func @critic_kernel(%arg0: i32, %arg1: memref<1x128xf32, #tpu.memory_space<vmem>>, %arg2: memref<32x1xf32, #tpu.memory_space<vmem>>, %arg3: memref<32x1xf32, #tpu.memory_space<vmem>>, %arg4: memref<32x32xf32, #tpu.memory_space<vmem>>, %arg5: memref<32x1xf32, #tpu.memory_space<vmem>>, %arg6: memref<32x1xf32, #tpu.memory_space<vmem>>, %arg7: memref<1xf32, #tpu.memory_space<smem>>, %arg8: memref<1x128xf32, #tpu.memory_space<vmem>>) attributes {dimension_semantics = [#tpu.dimension_semantics<parallel>], iteration_bounds = array<i64: 1>, scalar_prefetch = 0 : i64, scratch_operands = 0 : i64, tpu.core_type = #tpu.core_type<tc>, window_params = [{transform_indices = @transform_0, window_bounds = array<i64: 1, 128>}, {pipeline_mode = #tpu.pipeline_mode<synchronous>, transform_indices = @transform_1, window_bounds = array<i64: 32, 1>}, {pipeline_mode = #tpu.pipeline_mode<synchronous>, transform_indices = @transform_2, window_bounds = array<i64: 32, 1>}, {pipeline_mode = #tpu.pipeline_mode<synchronous>, transform_indices = @transform_3, window_bounds = array<i64: 32, 32>}, {pipeline_mode = #tpu.pipeline_mode<synchronous>, transform_indices = @transform_4, window_bounds = array<i64: 32, 1>}, {pipeline_mode = #tpu.pipeline_mode<synchronous>, transform_indices = @transform_5, window_bounds = array<i64: 32, 1>}, {transform_indices = @transform_6, window_bounds = array<i64: 1>}, {transform_indices = @transform_7, window_bounds = array<i64: 1, 128>}]} {
    %c0 = arith.constant 0 : index
    %c0_0 = arith.constant 0 : index
    %0 = vector.load %arg1[%c0, %c0_0] : memref<1x128xf32, #tpu.memory_space<vmem>>, vector<1x128xf32>
    %c0_1 = arith.constant 0 : index
    %c0_2 = arith.constant 0 : index
    %1 = vector.load %arg2[%c0_1, %c0_2] : memref<32x1xf32, #tpu.memory_space<vmem>>, vector<32x1xf32>
    %2 = vector.broadcast %1 : vector<32x1xf32> to vector<32x128xf32>
    %3 = vector.broadcast %0 : vector<1x128xf32> to vector<32x128xf32>
    %4 = arith.mulf %2, %3 : vector<32x128xf32>
    %c0_3 = arith.constant 0 : index
    %c0_4 = arith.constant 0 : index
    %5 = vector.load %arg3[%c0_3, %c0_4] : memref<32x1xf32, #tpu.memory_space<vmem>>, vector<32x1xf32>
    %6 = vector.broadcast %5 : vector<32x1xf32> to vector<32x128xf32>
    %7 = arith.addf %4, %6 : vector<32x128xf32>
    %cst = arith.constant 0.000000e+00 : f32
    %8 = vector.broadcast %cst : f32 to vector<32x128xf32>
    %9 = arith.maximumf %7, %8 : vector<32x128xf32>
    %c0_5 = arith.constant 0 : index
    %c0_6 = arith.constant 0 : index
    %10 = vector.load %arg4[%c0_5, %c0_6] : memref<32x32xf32, #tpu.memory_space<vmem>>, vector<32x32xf32>
    %cst_7 = arith.constant dense<0.000000e+00> : vector<32x128xf32>
    %11 = tpu.matmul %10, %9, %cst_7 {dimension_numbers = #tpu.dot_dimension_numbers<[1], [0], [0], [1], [0, 0, 1, 1], [], []>} : vector<32x32xf32>, vector<32x128xf32>, vector<32x128xf32> -> vector<32x128xf32>
    %c0_8 = arith.constant 0 : index
    %c0_9 = arith.constant 0 : index
    %12 = vector.load %arg5[%c0_8, %c0_9] : memref<32x1xf32, #tpu.memory_space<vmem>>, vector<32x1xf32>
    %13 = vector.broadcast %12 : vector<32x1xf32> to vector<32x128xf32>
    %14 = arith.addf %11, %13 : vector<32x128xf32>
    %cst_10 = arith.constant 0.000000e+00 : f32
    %15 = vector.broadcast %cst_10 : f32 to vector<32x128xf32>
    %16 = arith.maximumf %14, %15 : vector<32x128xf32>
    %c0_11 = arith.constant 0 : index
    %c0_12 = arith.constant 0 : index
    %17 = vector.load %arg6[%c0_11, %c0_12] : memref<32x1xf32, #tpu.memory_space<vmem>>, vector<32x1xf32>
    %18 = vector.broadcast %17 : vector<32x1xf32> to vector<32x128xf32>
    %19 = arith.mulf %18, %16 : vector<32x128xf32>
    %cst_13 = arith.constant dense<0.000000e+00> : vector<128xf32>
    %20 = vector.multi_reduction <add>, %19, %cst_13 [0] : vector<32x128xf32> to vector<128xf32>
    %21 = vector.shape_cast %20 : vector<128xf32> to vector<1x128xf32>
    %c0_14 = arith.constant 0 : index
    %22 = memref.load %arg7[%c0_14] : memref<1xf32, #tpu.memory_space<smem>>
    %23 = vector.broadcast %22 : f32 to vector<1x128xf32>
    %24 = arith.addf %21, %23 : vector<1x128xf32>
    %25 = arith.negf %24 : vector<1x128xf32>
    %26 = math.exp %25 : vector<1x128xf32>
    %cst_15 = arith.constant 1.000000e+00 : f32
    %27 = vector.broadcast %cst_15 : f32 to vector<1x128xf32>
    %28 = arith.addf %27, %26 : vector<1x128xf32>
    %29 = arith.divf %27, %28 : vector<1x128xf32>
    %c0_16 = arith.constant 0 : index
    %c0_17 = arith.constant 0 : index
    %30 = vector.load %arg8[%c0_16, %c0_17] : memref<1x128xf32, #tpu.memory_space<vmem>>, vector<1x128xf32>
    tpu.vector_store %arg8[%c0_16, %c0_17], %29 {strides = array<i32>} : memref<1x128xf32, #tpu.memory_space<vmem>>, vector<1x128xf32>,
    return
  }
  func.func @transform_0(%arg0: i32) -> (i32, i32) {
    %c0_i32 = arith.constant 0 : i32
    %c0_i32_0 = arith.constant 0 : i32
    return %c0_i32, %arg0 : i32, i32
  }
  func.func @transform_1(%arg0: i32) -> (i32, i32) {
    %c0_i32 = arith.constant 0 : i32
    %c0_i32_0 = arith.constant 0 : i32
    %c0_i32_1 = arith.constant 0 : i32
    return %c0_i32, %c0_i32_0 : i32, i32
  }
  func.func @transform_2(%arg0: i32) -> (i32, i32) {
    %c0_i32 = arith.constant 0 : i32
    %c0_i32_0 = arith.constant 0 : i32
    %c0_i32_1 = arith.constant 0 : i32
    return %c0_i32, %c0_i32_0 : i32, i32
  }
  func.func @transform_3(%arg0: i32) -> (i32, i32) {
    %c0_i32 = arith.constant 0 : i32
    %c0_i32_0 = arith.constant 0 : i32
    %c0_i32_1 = arith.constant 0 : i32
    return %c0_i32, %c0_i32_0 : i32, i32
  }
  func.func @transform_4(%arg0: i32) -> (i32, i32) {
    %c0_i32 = arith.constant 0 : i32
    %c0_i32_0 = arith.constant 0 : i32
    %c0_i32_1 = arith.constant 0 : i32
    return %c0_i32, %c0_i32_0 : i32, i32
  }
  func.func @transform_5(%arg0: i32) -> (i32, i32) {
    %c0_i32 = arith.constant 0 : i32
    %c0_i32_0 = arith.constant 0 : i32
    %c0_i32_1 = arith.constant 0 : i32
    return %c0_i32, %c0_i32_0 : i32, i32
  }
  func.func @transform_6(%arg0: i32) -> i32 {
    %c0_i32 = arith.constant 0 : i32
    %c0_i32_0 = arith.constant 0 : i32
    return %c0_i32 : i32
  }
  func.func @transform_7(%arg0: i32) -> (i32, i32) {
    %c0_i32 = arith.constant 0 : i32
    %c0_i32_0 = arith.constant 0 : i32
    return %c0_i32, %arg0 : i32, i32
  }
}

</mosaic_0001>

<bundles_post_ra>
// kernel: tpu_custom_call.1
= control target key start
LH: loop header
LB: loop body
LE: loop exit
PB: predicated region body
PF: predicated region fallthrough
CT: control target
= control target key end

     0   :  { %v358_v2 = vmov 0   ;;  %s482_s0 = inlined_call_operand.vmem [shape: f32[1,128], index: 0, kind: input, shape index: {}]   ;;  %s483_s1 = inlined_call_operand.vmem [shape: f32[32,1], index: 1, kind: input, shape index: {}]   ;;  %s484_s2 = inlined_call_operand.vmem [shape: f32[32,1], index: 2, kind: input, shape index: {}]   ;;  %s485_s3 = inlined_call_operand.vmem [shape: f32[32,32], index: 3, kind: input, shape index: {}]   ;;  %s486_s4 = inlined_call_operand.vmem [shape: f32[32,1], index: 4, kind: input, shape index: {}]   ;;  %s487_s5 = inlined_call_operand.vmem [shape: f32[32,1], index: 5, kind: input, shape index: {}]   ;;  %s488_s6 = inlined_call_operand.<no memory space> [shape: f32[1], index: 6, kind: input, shape index: {}]   ;;  %s489_s7 = inlined_call_operand.hbm [shape: f32[1,128], index: 7, kind: output, shape index: {}]  }
   0x1   :  { %v63_v0 = vld [vmem:[%s484_s2] sm:$0xff]  ;;  %329 = vset.pattern.permute.xlu1 %v358_v2  ;;  %328 = vset.pattern.permute.xlu0 %v358_v2  ;;  %v64_v3 = vld [vmem:[%s484_s2 + $0x8] sm:$0xff] }
   0x2   :  { %v29_v1 = vld [vmem:[%s483_s1] sm:$0xff]  ;;  %69 = vperm.xlu1 %329, %v63_v0   ;;  %v30_v4 = vld [vmem:[%s483_s1 + $0x8] sm:$0xff] }
   0x3   :  { %35 = vperm.xlu0 %328, %v29_v1  }
   0x4   :  { %13 = vsyncpa [#allocation4], 0  ;;  %v32_v5 = vld [vmem:[%s483_s1 + $0x18] sm:$0xff]  ;;  %v31_v6 = vld [vmem:[%s483_s1 + $0x10] sm:$0xff]  ;;  %vm123_vm0 = vcmask 261120   ;;  %s359_s16 = smov [#allocation3]  }
   0x5   :  { %v66_v7 = vld [vmem:[%s484_s2 + $0x18] sm:$0xff]  ;;  %v65_v8 = vld [vmem:[%s484_s2 + $0x10] sm:$0xff]  ;;  %v100_v9 = vld [vmem:[%s486_s4 + $0x8] sm:$0xff]  ;;  %s278_s17 = sshll.u32 %s359_s16, 4  ;;  %s279_s17 = int_to_ptr.vmem [resolvable:$true] %s278_s17 }
   0x6   :  { %74 = vperm.xlu1 %329, %v64_v3   ;;  %v99_v10 = vld [vmem:[%s486_s4] sm:$0xff]  ;;  %v102_v11 = vld [vmem:[%s486_s4 + $0x18] sm:$0xff]  ;;  %v101_v12 = vld [vmem:[%s486_s4 + $0x10] sm:$0xff]  ;;  %s334_s18 = scalar_lea.vmem %s279_s17, 16  ;;  %s338_s19 = scalar_lea.vmem %s279_s17, 32 }
   0x7   :  { %40 = vperm.xlu0 %328, %v30_v4   ;;  %v95_v13 = vld [vmem:[%s485_s3] sm:$0xff]  ;;  %v97_v14 = vld [vmem:[%s485_s3 + $0x10] sm:$0xff]  ;;  %v226_v15 = vld [vmem:[%s487_s5 + $0x8] sm:$0xff]  ;;  %p335_p0 = scmp.ne.s32.totalorder %s279_s17, %s334_s18  ;;  %p339_p1 = scmp.lt.s32.totalorder %s279_s17, %s279_s17 }
   0x8   :  { %v225_v16 = vld [vmem:[%s487_s5] sm:$0xff]  ;;  %308 = vmatprep.mubr.msk.f32.mxu0 %vm123_vm0, %v95_v13  ;;  %311 = vmatprep.mubr.msk.f32.mxu1 %vm123_vm0, %v97_v14  ;;  %v228_v17 = vld [vmem:[%s487_s5 + $0x18] sm:$0xff]  ;;  %v227_v18 = vld [vmem:[%s487_s5 + $0x10] sm:$0xff]  ;;  %p340_p2 = scmp.lt.s32.totalorder %s338_s19, %s334_s18 }
   0x9   :  { %v286_v19 = vld [vmem:[%s482_s0] ss:$0 sm:$0xff]  ;;  %v96_v42 = vld [vmem:[%s485_s3 + $0x8] sm:$0xff]  ;;  %v98_v43 = vld [vmem:[%s485_s3 + $0x18] sm:$0xff] }
   0xa   :  { %50 = vperm.xlu1 %329, %v32_v5   ;;  %p341_p3 = por %p340_p2, %p339_p1 }
   0xb   :  { %45 = vperm.xlu0 %328, %v31_v6  }
   0xc   :  { %p342_p4 = pnand %p341_p3, %p335_p0 }
   0xe   :  { %84 = vperm.xlu1 %329, %v66_v7  }
   0xf   :  { %79 = vperm.xlu0 %328, %v65_v8  }
  0x12   :  { %110 = vperm.xlu1 %329, %v100_v9  }
  0x13   :  { %105 = vperm.xlu0 %328, %v99_v10  }
  0x16   :  { %120 = vperm.xlu1 %329, %v102_v11  }
  0x17   :  { %115 = vperm.xlu0 %328, %v101_v12   ;;  %v263_v12 = vstv %s488_s6 }
  0x1a   :  { %236 = vperm.xlu1 %329, %v226_v15  }
  0x1b   :  { %231 = vperm.xlu0 %328, %v225_v16  }
  0x1e   :  { %246 = vperm.xlu1 %329, %v228_v17  }
  0x1f   :  { %241 = vperm.xlu0 %328, %v227_v18  }
  0x81   :  { %v70_v20 = vpop.permute.xlu1 %69 }
  0x82   :  { %v36_v21 = vpop.permute.xlu0 %35 }
  0x83   :  { %v59_v22 = vmul.f32 %v286_v19, %v36_v21 }
  0x85   :  { %v75_v23 = vpop.permute.xlu1 %74  ;;  %v87_v25 = vadd.f32 %v70_v20, %v59_v22 }
  0x86   :  { %v41_v24 = vpop.permute.xlu0 %40 }
  0x87   :  { %v60_v26 = vmul.f32 %v286_v19, %v41_v24  ;;  %v91_v30 = vmax.f32 %v87_v25, 0.0 }
  0x89   :  { %v88_v27 = vadd.f32 %v75_v23, %v60_v26  ;;  %v51_v28 = vpop.permute.xlu1 %50 }
  0x8a   :  { %v46_v29 = vpop.permute.xlu0 %45  ;;  %v62_v33 = vmul.f32 %v286_v19, %v51_v28 }
  0x8b   :  { %v92_v31 = vmax.f32 %v88_v27, 0.0  ;;  %v61_v34 = vmul.f32 %v286_v19, %v46_v29 }
  0x8d   :  { %v314_v32 = vpack.c.bf16 %v92_v31, %v91_v30  ;;  %v85_v35 = vpop.permute.xlu1 %84 }
  0x8e   :  { %v80_v36 = vpop.permute.xlu0 %79  ;;  %v90_v37 = vadd.f32 %v85_v35, %v62_v33 }
  0x8f   :  { %v89_v38 = vadd.f32 %v80_v36, %v61_v34  ;;  %315 = vmatprep.subr.bf16.mxu0 %v314_v32  ;;  %322 = vmatprep.subr.bf16.mxu1 %v314_v32 }
  0x90   :  { %317 = vmatpush3.bf16.msra.mxu0 %v314_v32  ;;  %324 = vmatpush3.bf16.msra.mxu1 %v314_v32  ;;  %v94_v39 = vmax.f32 %v90_v37, 0.0 }
  0x91   :  { %v93_v40 = vmax.f32 %v89_v38, 0.0  ;;  %v111_v45 = vpop.permute.xlu1 %110 }
  0x92   :  { %v106_v44 = vpop.permute.xlu0 %105 }
  0x93   :  { %v318_v41 = vpack.c.bf16 %v94_v39, %v93_v40 }
  0x95   :  { %319 = vmatprep.subr.bf16.mxu0 %v318_v41  ;;  %323 = vmatprep.subr.bf16.mxu1 %v318_v41  ;;  %v121_v47 = vpop.permute.xlu1 %120 }
  0x96   :  { %321 = vmatpush3.bf16.msra.mxu0 %v318_v41  ;;  %325 = vmatpush3.bf16.msra.mxu1 %v318_v41  ;;  %v116_v46 = vpop.permute.xlu0 %115 }
  0x99   :  { %309 = vmatmul.mubr.msk.f32.vlgmr.msra.gmra.mrb[0].mxu0 %vm123_vm0, %v96_v42  ;;  %312 = vmatmul.mubr.msk.f32.vlgmr.msra.gmra.mrb[0].mxu1 %vm123_vm0, %v98_v43  ;;  %v237_v57 = vpop.permute.xlu1 %236 }
  0x9a   :  { %v232_v48 = vpop.permute.xlu0 %231 }
  0x9d   :  { %v247_v3 = vpop.permute.xlu1 %246 }
  0x9e   :  { %v242_v0 = vpop.permute.xlu0 %241 }
 0x16c   :  { %v310_v49 = vpop.f32.mrb[0].mxu0  ;;  %v313_v50 = vpop.f32.mrb[0].mxu1 }
 0x16d   :  { %v208_v51 = vadd.f32 %v310_v49, %v111_v45  ;;  %v202_v52 = vpop.f32.mrb[1].mxu0  ;;  %v212_v53 = vpop.f32.mrb[1].mxu1  ;;  %v218_v54 = vadd.f32 %v313_v50, %v121_v47 }
 0x16e   :  { %v203_v55 = vadd.f32 %v202_v52, %v106_v44  ;;  %v213_v56 = vadd.f32 %v212_v53, %v116_v46 }
 0x16f   :  { %v222_v58 = vmax.f32 %v208_v51, 0.0  ;;  %v224_v62 = vmax.f32 %v218_v54, 0.0 }
 0x170   :  { %v221_v59 = vmax.f32 %v203_v55, 0.0  ;;  %v223_v60 = vmax.f32 %v213_v56, 0.0 }
 0x171   :  { %v250_v61 = vmul.f32 %v237_v57, %v222_v58  ;;  %v252_v4 = vmul.f32 %v247_v3, %v224_v62 }
 0x172   :  { %v249_v63 = vmul.f32 %v232_v48, %v221_v59  ;;  %v251_v2 = vmul.f32 %v242_v0, %v223_v60 }
 0x174   :  { %v253_v1 = vadd.f32 %v250_v61, %v249_v63 }
 0x176   :  { %v254_v5 = vadd.f32 %v253_v1, %v251_v2 }
 0x178   :  { %v255_v6 = vadd.f32 %v254_v5, %v252_v4 }
 0x17a   :  { %v256_v7 = vrot.slane %v255_v6, 4 }
 0x17c   :  { %v257_v8 = vadd.f32 %v256_v7, %v255_v6 }
 0x17e   :  { %v258_v9 = vrot.slane %v257_v8, 2 }
 0x180   :  { %v259_v10 = vadd.f32 %v258_v9, %v257_v8 }
 0x182   :  { %v260_v11 = vrot.slane %v259_v10, 1 }
 0x184   :  { %v261_v13 = vadd.f32 %v260_v11, %v259_v10 }
 0x186   :  { %v264_v14 = vadd.f32 %v263_v12, %v261_v13 }
 0x188   :  { %v291_v15 = vmul.f32 -1.442695, %v264_v14 }
 0x18a   :  { %330 = vpow2.f32 %v291_v15 }
 0x194   :  { %v331_v16 = vpop.eup %330 }
 0x195   :  { %v268_v17 = vadd.f32 1.0, %v331_v16 }
 0x197   :  { %332 = vrcp.f32 %v268_v17 }
 0x1a1   :  { %v333_v18 = vpop.eup %332 }
 0x1a2   :  { %271 = vst [vmem:[#allocation3] sm:$0x1] %v333_v18 }
 0x1a3   :  { %345 = shalt.err (!%p342_p4)
}
 0x1a4   :  { %s346_s1 = scalar_lea.hbm %s489_s7, 16 }
 0x1a5   :  { %p347_p5 = scmp.ne.s32.totalorder %s489_s7, %s346_s1  ;;  %p350_p6 = scmp.lt.u32.totalorder %s346_s1, %s489_s7 }
 0x1a7   :  { %p352_p7 = pnand %p350_p6, %p347_p5 }
 0x1a9   :  { %355 = shalt.err (!%p352_p7)
}
 0x1aa   :  { %281 = dma.vmem_to_hbm [thread:$0]  %s279_s17, 16, %s489_s7, [#allocation4]  }
 0x1ab   :  { %356 = dma.done.wait [#allocation4], 16  }
 0x1ac   :  { %357 = vsyncadd [#allocation4], 4294967280 }
 0x1ad   :  { %285 = vsyncpa [#allocation4], 1 }

</bundles_post_ra>
